<compile_context>
chip_gen: v6e
topology: v6e:2x2x1
jax: 0.10.0
libtpu: 0.0.40
codegen_flags: <defaults>
</compile_context>

<pallas_src>
import functools

import jax
import jax.numpy as jnp
from jax import lax
from jax.experimental import pallas as pl
from jax.experimental.pallas import tpu as pltpu


def _round_up(a, b):
    return (a + b - 1) // b * b


def _sublane_base(itemsize):
    # sublane packing: 8 rows for 32-bit, 16 for 16-bit, 32 for 8-bit dtypes
    return {4: 8, 2: 16, 1: 32}.get(itemsize, 8)


def _hw_config():
    """Generation-aware budgets (v5e/v6e: 128 MiB VMEM, 1 TC; v7x: 64 MiB, 2 TCs)."""
    vmem_cap = 128 * 1024 * 1024
    try:
        vmem_cap = int(pltpu.get_tpu_info().vmem_capacity_bytes)
    except Exception:
        pass
    if vmem_cap <= 0:
        vmem_cap = 128 * 1024 * 1024
    small_vmem = vmem_cap <= 80 * 1024 * 1024          # v7x-class TensorCore
    block_bytes = (3 if small_vmem else 6) * 1024 * 1024
    row_budget = int(vmem_cap * (0.45 if small_vmem else 0.50))
    num_tc = 2 if small_vmem else 1                    # v7x has 2 TCs per chip
    # ~80% of physical VMEM (capped) leaves headroom for double buffers/scratch.
    vmem_cap_limit = min(int(vmem_cap * 0.8), 100 * 1024 * 1024)
    return block_bytes, row_budget, num_tc, vmem_cap_limit


# ---------------------------------------------------------------------------
# Single-pass kernel: one (TB, N) full-row block per grid step.
# ---------------------------------------------------------------------------
def _cln_row_kernel(params_ref, x_ref, o_ref, *, eps, inv_n):
    x = x_ref[...].astype(jnp.float32)                       # (TB, N)
    mean = jnp.sum(x, axis=-1, keepdims=True) * inv_n        # (TB, 1)
    ex2 = jnp.sum(x * x, axis=-1, keepdims=True) * inv_n
    var = jnp.maximum(ex2 - mean * mean, 0.0)                # biased variance
    rstd = lax.rsqrt(var + eps)
    gamma = 1.0 + params_ref[:, 0:1].astype(jnp.float32)     # (TB, 1)
    beta = params_ref[:, 1:2].astype(jnp.float32)            # (TB, 1)
    scale = rstd * gamma                                     # folded constants
    shift = beta - mean * scale
    o_ref[...] = (x * scale + shift).astype(o_ref.dtype)


# ---------------------------------------------------------------------------
# Two-pass kernel for very large rows: grid = (row_blocks, 2, col_blocks).
#   pass 0: merge per-column-block stats (Chan / parallel-variance update).
#   pass 1: normalize each (TB, TN) tile and write it out.
# ---------------------------------------------------------------------------
def _cln_tiled_kernel(params_ref, x_ref, o_ref, mean_ref, m2_ref, *,
                      eps, n_total, tn, ragged):
    p = pl.program_id(1)
    j = pl.program_id(2)

    x = x_ref[...].astype(jnp.float32)                       # (TB, TN)

    @pl.when((p == 0) & (j == 0))
    def _():
        mean_ref[...] = jnp.zeros_like(mean_ref)
        m2_ref[...] = jnp.zeros_like(m2_ref)

    @pl.when(p == 0)
    def _():
        # Numerically stable combination (no E[x^2] - mean^2 cancellation).
        n_b_i = jnp.minimum(jnp.int32(tn), jnp.int32(n_total) - j * tn)
        n_b = n_b_i.astype(jnp.float32)
        if ragged:
            col = lax.broadcasted_iota(jnp.int32, x.shape, 1)
            valid = col < n_b_i
            xs = jnp.where(valid, x, 0.0)
            blk_mean = jnp.sum(xs, axis=-1, keepdims=True) / n_b
            d = jnp.where(valid, x - blk_mean, 0.0)
        else:
            blk_mean = jnp.sum(x, axis=-1, keepdims=True) / n_b
            d = x - blk_mean
        blk_m2 = jnp.sum(d * d, axis=-1, keepdims=True)
        n_a = (j * tn).astype(jnp.float32)
        tot = n_a + n_b
        delta = blk_mean - mean_ref[...]
        m2_ref[...] = m2_ref[...] + blk_m2 + (delta * delta) * (n_a * n_b / tot)
        mean_ref[...] = mean_ref[...] + delta * (n_b / tot)

    @pl.when(p == 1)
    def _():
        mean = mean_ref[...]                                  # (TB, 1)
        var = m2_ref[...] * (1.0 / float(n_total))            # biased
        rstd = lax.rsqrt(var + eps)
        gamma = 1.0 + params_ref[:, 0:1].astype(jnp.float32)
        beta = params_ref[:, 1:2].astype(jnp.float32)
        scale = rstd * gamma
        shift = beta - mean * scale
        o_ref[...] = (x * scale + shift).astype(o_ref.dtype)


# ---------------------------------------------------------------------------
# Tiling helpers
# ---------------------------------------------------------------------------
def _choose_row_tb(batch, n, itemsize, base, block_bytes_target):
    row_bytes = max(n * itemsize, 1)
    rows = max(base, (block_bytes_target // row_bytes) // base * base)
    rows = min(rows, max(base, (batch // base) * base))
    return int(rows)


def _choose_tn(n, tb, itemsize, block_bytes_target, max_tn=None):
    """Column tile: multiple of 128, within the per-buffer byte budget."""
    cap = max(128, (block_bytes_target // max(tb * itemsize, 1)) // 128 * 128)
    if max_tn is not None:
        cap = max(128, min(cap, (max_tn // 128) * 128))
    tn = min(cap, _round_up(n, 128))
    return int(max(128, (tn // 128) * 128))


def _x_tile_spec(shape, index_map):
    # Buffered(3) input pipelining for the (DMA-bound) stats pass; fall back
    # silently if this Pallas build lacks BlockSpec pipeline_mode.
    if hasattr(pl, "Buffered"):
        try:
            return pl.BlockSpec(shape, index_map, pipeline_mode=pl.Buffered(3))
        except TypeError:
            pass
    return pl.BlockSpec(shape, index_map)


# ---------------------------------------------------------------------------
# Wrapper
# ---------------------------------------------------------------------------
def conditional_ln(x, params, eps=1e-5, *, force_tiled=False, max_tn=None):
    """Conditional LN over the (C, H, W) dims of an NCHW tensor.

    x: (B, C, H, W);  params: (B, 2) = [delta_gamma, delta_beta] per sample.
    """
    B, C, H, W = x.shape
    assert params.shape == (B, 2)
    N = C * H * W

    itemsize = jnp.dtype(x.dtype).itemsize
    base = _sublane_base(itemsize)
    block_bytes, row_budget, num_tc, vmem_cap_limit = _hw_config()

    x2d = x.reshape(B, N)

    # Working bytes per element: in/out double buffers + f32 compute copies.
    bytes_per_elem = 4 * itemsize + 8
    tb_min = B if B <= base else base
    use_tiled = force_tiled or (tb_min * N * bytes_per_elem > row_budget)

    if use_tiled:
        tb = B if B <= base else base
        tn = _choose_tn(N, tb, itemsize, block_bytes, max_tn)
        cols = tn
    else:
        if B <= base:
            tb = B                       # block dim == full array dim
        else:
            tb = _choose_row_tb(B, N, itemsize, base, block_bytes)
            if num_tc > 1:
                # keep >= num_tc row blocks on the "parallel" axis (both TCs busy)
                tb = min(tb, max(base,
                                 _round_up((B + num_tc - 1) // num_tc, base)))
        cols = N
    rb = (B + tb - 1) // tb              # ragged final row block handled in-kernel

    # Raise the scoped-VMEM limit whenever the working set could exceed the
    # smallest per-generation default (v5e: 16 MiB); cap at ~80% of physical
    # VMEM so v7x (64 MiB/TC) keeps headroom.
    tile_bytes = tb * cols * itemsize
    est = tb * cols * bytes_per_elem
    need_limit = (tile_bytes >= (3 * 1024 * 1024) // 2) or (est > 8 * 1024 * 1024)
    vmem_limit = vmem_cap_limit if need_limit else None

    if use_tiled:
        ragged = (N % tn) != 0
        cb = (N + tn - 1) // tn
        kernel = functools.partial(_cln_tiled_kernel, eps=float(eps),
                                   n_total=int(N), tn=int(tn), ragged=ragged)
        out2d = pl.pallas_call(
            kernel,
            out_shape=jax.ShapeDtypeStruct((B, N), x.dtype),
            grid_spec=pltpu.PrefetchScalarGridSpec(
                num_scalar_prefetch=0,
                grid=(rb, 2, cb),
                in_specs=[
                    pl.BlockSpec((tb, 2), lambda i, p, j: (i, 0)),
                    _x_tile_spec((tb, tn), lambda i, p, j: (i, j)),
                ],
                # Output block stays pinned at column 0 during the stats pass
                # (p == 0): no garbage writebacks; pass 1 walks the columns.
                out_specs=pl.BlockSpec((tb, tn), lambda i, p, j: (i, j * p)),
                scratch_shapes=[
                    pltpu.VMEM((tb, 1), jnp.float32),   # running mean
                    pltpu.VMEM((tb, 1), jnp.float32),   # running M2
                ],
            ),
            compiler_params=pltpu.CompilerParams(
                dimension_semantics=("parallel", "arbitrary", "arbitrary"),
                vmem_limit_bytes=vmem_limit),
        )(params, x2d)
    else:
        kernel = functools.partial(_cln_row_kernel, eps=float(eps),
                                   inv_n=1.0 / float(N))
        out2d = pl.pallas_call(
            kernel,
            out_shape=jax.ShapeDtypeStruct((B, N), x.dtype),
            grid_spec=pltpu.PrefetchScalarGridSpec(
                num_scalar_prefetch=0,
                grid=(rb,),
                in_specs=[
                    pl.BlockSpec((tb, 2), lambda i: (i, 0)),
                    pl.BlockSpec((tb, N), lambda i: (i, 0)),
                ],
                out_specs=pl.BlockSpec((tb, N), lambda i: (i, 0)),
            ),
            compiler_params=pltpu.CompilerParams(
                dimension_semantics=("parallel",),
                vmem_limit_bytes=vmem_limit),
        )(params, x2d)

    return out2d.reshape(B, C, H, W)


# ---------------------------------------------------------------------------
# Pure-JAX reference
# ---------------------------------------------------------------------------
def _reference(x, params, eps=1e-5):
    xf = x.astype(jnp.float32)
    mean = jnp.mean(xf, axis=(1, 2, 3), keepdims=True)
    var = jnp.var(xf, axis=(1, 2, 3), keepdims=True)      # biased
    normed = (xf - mean) / jnp.sqrt(var + eps)
    new_gamma = (1.0 + params[:, 0])[:, None, None, None]
    new_beta = (0.0 + params[:, 1])[:, None, None, None]
    return (normed * new_gamma + new_beta).astype(x.dtype)


if __name__ == "__main__":
    key = jax.random.PRNGKey(0)
    kx, kp, kx1, kp1, kx2, kp2 = jax.random.split(key, 6)

    # Spec shape: NCHW, dim = (C, H, W) -> per-sample LN over C*H*W.
    B, C, H, W = 2, 4, 16, 16
    x = jax.random.normal(kx, (B, C, H, W), dtype=jnp.float32)
    params = 0.1 * jax.random.normal(kp, (B, 2), dtype=jnp.float32)
    out = jax.block_until_ready(conditional_ln(x, params))
    ref = _reference(x, params)
    assert out.shape == (B, C, H, W)
    assert jnp.allclose(out, ref, atol=1e-5, rtol=1e-5)

    # Unaligned batch (B=10, not a multiple of the 8-row sublane tile):
    # exercised via a ragged final row block, no host-side pad/slice.
    B1, C1, H1, W1 = 10, 4, 16, 16
    x1 = jax.random.normal(kx1, (B1, C1, H1, W1), dtype=jnp.float32)
    params1 = 0.1 * jax.random.normal(kp1, (B1, 2), dtype=jnp.float32)
    out1 = jax.block_until_ready(conditional_ln(x1, params1))
    ref1 = _reference(x1, params1)
    assert out1.shape == (B1, C1, H1, W1)
    assert jnp.allclose(out1, ref1, atol=1e-5, rtol=1e-5)

    # Two-pass N-tiled path with a ragged final column block (N=1280, tn=512).
    B2, C2, H2, W2 = 4, 5, 16, 16
    x2 = jax.random.normal(kx2, (B2, C2, H2, W2), dtype=jnp.float32)
    params2 = 0.1 * jax.random.normal(kp2, (B2, 2), dtype=jnp.float32)
    out2 = jax.block_until_ready(
        conditional_ln(x2, params2, force_tiled=True, max_tn=512))
    ref2 = _reference(x2, params2)
    assert out2.shape == (B2, C2, H2, W2)
    assert jnp.allclose(out2, ref2, atol=1e-4, rtol=1e-4)

    print("KERNEL_OK")
</pallas_src>

<mosaic_0001>
module attributes {stable_mosaic.version = 11 : i64} {
  func.func @_cln_row_kernel(%arg0: i32, %arg1: memref<2x2xf32, #tpu.memory_space<vmem>>, %arg2: memref<2x1024xf32, #tpu.memory_space<vmem>>, %arg3: memref<2x1024xf32, #tpu.memory_space<vmem>>) attributes {dimension_semantics = [#tpu.dimension_semantics<parallel>], iteration_bounds = array<i64: 1>, scalar_prefetch = 0 : i64, scratch_operands = 0 : i64, tpu.core_type = #tpu.core_type<tc>, window_params = [{transform_indices = @transform_0, window_bounds = array<i64: 2, 2>}, {transform_indices = @transform_1, window_bounds = array<i64: 2, 1024>}, {transform_indices = @transform_2, window_bounds = array<i64: 2, 1024>}]} {
    %c0 = arith.constant 0 : index
    %c0_0 = arith.constant 0 : index
    %0 = vector.load %arg2[%c0, %c0_0] : memref<2x1024xf32, #tpu.memory_space<vmem>>, vector<2x1024xf32>
    %cst = arith.constant dense<0.000000e+00> : vector<2xf32>
    %1 = vector.multi_reduction <add>, %0, %cst [1] : vector<2x1024xf32> to vector<2xf32>
    %2 = vector.shape_cast %1 : vector<2xf32> to vector<2x1xf32>
    %cst_1 = arith.constant 9.765625E-4 : f32
    %3 = vector.broadcast %cst_1 : f32 to vector<2x1xf32>
    %4 = arith.mulf %2, %3 : vector<2x1xf32>
    %5 = arith.mulf %0, %0 : vector<2x1024xf32>
    %cst_2 = arith.constant dense<0.000000e+00> : vector<2xf32>
    %6 = vector.multi_reduction <add>, %5, %cst_2 [1] : vector<2x1024xf32> to vector<2xf32>
    %7 = vector.shape_cast %6 : vector<2xf32> to vector<2x1xf32>
    %cst_3 = arith.constant 9.765625E-4 : f32
    %8 = vector.broadcast %cst_3 : f32 to vector<2x1xf32>
    %9 = arith.mulf %7, %8 : vector<2x1xf32>
    %10 = arith.mulf %4, %4 : vector<2x1xf32>
    %11 = arith.subf %9, %10 : vector<2x1xf32>
    %cst_4 = arith.constant 0.000000e+00 : f32
    %12 = vector.broadcast %cst_4 : f32 to vector<2x1xf32>
    %13 = arith.maximumf %11, %12 : vector<2x1xf32>
    %cst_5 = arith.constant 9.99999974E-6 : f32
    %14 = vector.broadcast %cst_5 : f32 to vector<2x1xf32>
    %15 = arith.addf %13, %14 : vector<2x1xf32>
    %16 = math.rsqrt %15 : vector<2x1xf32>
    %c0_6 = arith.constant 0 : index
    %c0_7 = arith.constant 0 : index
    %17 = vector.load %arg1[%c0_6, %c0_7] : memref<2x2xf32, #tpu.memory_space<vmem>>, vector<2x1xf32>
    %cst_8 = arith.constant 1.000000e+00 : f32
    %18 = vector.broadcast %cst_8 : f32 to vector<2x1xf32>
    %19 = arith.addf %18, %17 : vector<2x1xf32>
    %c0_9 = arith.constant 0 : index
    %c1 = arith.constant 1 : index
    %20 = vector.load %arg1[%c0_9, %c1] : memref<2x2xf32, #tpu.memory_space<vmem>>, vector<2x1xf32>
    %21 = arith.mulf %16, %19 : vector<2x1xf32>
    %22 = arith.mulf %4, %21 : vector<2x1xf32>
    %23 = arith.subf %20, %22 : vector<2x1xf32>
    %24 = vector.broadcast %21 : vector<2x1xf32> to vector<2x1024xf32>
    %25 = arith.mulf %0, %24 : vector<2x1024xf32>
    %26 = vector.broadcast %23 : vector<2x1xf32> to vector<2x1024xf32>
    %27 = arith.addf %25, %26 : vector<2x1024xf32>
    %c0_10 = arith.constant 0 : index
    %c0_11 = arith.constant 0 : index
    %28 = vector.load %arg3[%c0_10, %c0_11] : memref<2x1024xf32, #tpu.memory_space<vmem>>, vector<2x1024xf32>
    tpu.vector_store %arg3[%c0_10, %c0_11], %27 {strides = array<i32>} : memref<2x1024xf32, #tpu.memory_space<vmem>>, vector<2x1024xf32>,
    return
  }
  func.func @transform_0(%arg0: i32) -> (i32, i32) {
    %c0_i32 = arith.constant 0 : i32
    %c0_i32_0 = arith.constant 0 : i32
    return %arg0, %c0_i32 : i32, i32
  }
  func.func @transform_1(%arg0: i32) -> (i32, i32) {
    %c0_i32 = arith.constant 0 : i32
    %c0_i32_0 = arith.constant 0 : i32
    return %arg0, %c0_i32 : i32, i32
  }
  func.func @transform_2(%arg0: i32) -> (i32, i32) {
    %c0_i32 = arith.constant 0 : i32
    %c0_i32_0 = arith.constant 0 : i32
    return %arg0, %c0_i32 : i32, i32
  }
}

</mosaic_0001>

<bundles_post_ra>
// kernel: tpu_custom_call.1
= control target key start
LH: loop header
LB: loop body
LE: loop exit
PB: predicated region body
PF: predicated region fallthrough
CT: control target
= control target key end

     0   :  { %7 = vsyncpa [#allocation3], 0  ;;  %s373_s0 = inlined_call_operand.hbm [shape: f32[2,2], index: 0, kind: input, shape index: {}]   ;;  %s374_s1 = inlined_call_operand.hbm [shape: f32[2,1024], index: 1, kind: input, shape index: {}]   ;;  %s375_s2 = inlined_call_operand.hbm [shape: f32[2,1024], index: 2, kind: output, shape index: {}]  }
   0x1   :  { %8 = vsyncpa [#allocation6], 0 }
   0x2   :  { %9 = vsyncpa [#allocation4], 0  ;;  %s305_s9 = smov [#allocation2]   ;;  %s306_s11 = smov [#allocation5]  }
   0x3   :  { %s16_s10 = sshll.u32 %s305_s9, 4  ;;  %s26_s12 = sshll.u32 %s306_s11, 4  ;;  %s17_s10 = int_to_ptr.vmem [resolvable:$true] %s16_s10  ;;  %s27_s12 = int_to_ptr.vmem [resolvable:$true] %s26_s12 }
   0x4   :  { %s247_s13 = scalar_lea.vmem %s17_s10, 32  ;;  %p252_p1 = scmp.lt.s32.totalorder %s17_s10, %s17_s10 }
   0x5   :  { %p248_p0 = scmp.ne.s32.totalorder %s17_s10, %s247_s13  ;;  %p253_p2 = scmp.lt.s32.totalorder %s247_s13, %s247_s13 }
   0x7   :  { %p254_p3 = por %p253_p2, %p252_p1 }
   0x9   :  { %p255_p4 = pnand %p254_p3, %p248_p0 }
   0xb   :  { %258 = shalt.err (!%p255_p4)
}
   0xc   :  { %19 = dma.hbm_to_vmem [thread:$0]  %s373_s0, 32, %s17_s10, [#allocation3]  }
   0xd   :  { %s267_s16 = scalar_lea.vmem %s27_s12, 256  ;;  %p272_p6 = scmp.lt.s32.totalorder %s27_s12, %s27_s12 }
   0xe   :  { %p268_p5 = scmp.ne.s32.totalorder %s27_s12, %s267_s16  ;;  %p273_p7 = scmp.lt.s32.totalorder %s267_s16, %s267_s16 }
  0x10   :  { %p274_p8 = por %p273_p7, %p272_p6 }
  0x12   :  { %p275_p9 = pnand %p274_p8, %p268_p5 }
  0x14   :  { %278 = shalt.err (!%p275_p9)
}
  0x15   :  { %29 = dma.hbm_to_vmem [thread:$0]  %s374_s1, 256, %s27_s12, [#allocation6]  }
  0x16   :  { %299 = dma.done.wait [#allocation3], 32  }
  0x17   :  { %300 = vsyncadd [#allocation3], 4294967264 }
  0x18   :  { %301 = dma.done.wait [#allocation6], 256  }
  0x19   :  { %302 = vsyncadd [#allocation6], 4294967040  ;;  %v44_v0 = vlaneseq  ;;  %v307_v1 = vmov 1983009808   ;;  %v337_v6 = vld [vmem:[#allocation5] sm:$0xff]  ;;  %v339_v7 = vld [vmem:[#allocation5 + $0x8] sm:$0xff] }
  0x1a   :  { %v42_v2 = vunpack.c.l.s4 %v307_v1  ;;  %v40_v8 = vcombine.high %v337_v6, %v337_v6  ;;  %vm82_vm0 = vcmask 1041408   ;;  %v57_v10 = vcombine.high %v339_v7, %v339_v7  ;;  %s310_s0 = smov 1   ;;  %s312_s1 = smov [#allocation7]  }
  0x1b   :  { %v334_v3 = vshrl.u32 %v44_v0, 7  ;;  %v101_v11 = vmul.f32 %v337_v6, %v337_v6  ;;  %v102_v16 = vmul.f32 %v339_v7, %v339_v7  ;;  %v308_v60 = vmov 0   ;;  %s215_s19 = sshll.u32 %s312_s1, 4  ;;  %s216_s19 = int_to_ptr.vmem [resolvable:$true] %s215_s19 }
  0x1c   :  { %v43_v4 = vunpack.c.0.s8 %v42_v2  ;;  %233 = vset.pattern.permute.xlu1 %v308_v60  ;;  %s279_s20 = scalar_lea.vmem %s216_s19, 256  ;;  %p284_p11 = scmp.lt.s32.totalorder %s216_s19, %s216_s19 }
  0x1d   :  { %v105_v17 = vcombine.high %v101_v11, %v101_v11  ;;  %v122_v28 = vcombine.high %v102_v16, %v102_v16  ;;  %p280_p10 = scmp.ne.s32.totalorder %s216_s19, %s279_s20  ;;  %p285_p12 = scmp.lt.s32.totalorder %s279_s20, %s279_s20 }
  0x1e   :  { %v46_v5 = vsub.s32 %v43_v4, %v334_v3 }
  0x1f   :  { %p286_p13 = por %p285_p12, %p284_p11 }
  0x20   :  { %v47_v9 = vrot.slane %v337_v6, %v46_v5  ;;  %v54_v12 = vrot.slane %v40_v8, %v46_v5  ;;  %v64_v14 = vrot.slane %v339_v7, %v46_v5  ;;  %v112_v18 = vrot.slane %v101_v11, %v46_v5 }
  0x21   :  { %v71_v22 = vrot.slane %v57_v10, %v46_v5  ;;  %v119_v24 = vrot.slane %v105_v17, %v46_v5  ;;  %v129_v31 = vrot.slane %v102_v16, %v46_v5  ;;  %v136_v40 = vrot.slane %v122_v28, %v46_v5  ;;  %p287_p0 = pnand %p286_p13, %p280_p10 }
  0x22   :  { %v55_v13 = vcombine.high %v47_v9, %v47_v9  ;;  %v83_v15 = vsel %vm82_vm0, %v47_v9, 0.0  ;;  %v56_v19 = vcombine.high %v54_v12, %v54_v12  ;;  %v86_v21 = vsel %vm82_vm0, %v54_v12, 0.0  ;;  %v170_v9 = vld [vmem:[#allocation2] sm:$0x3] }
  0x23   :  { %v72_v25 = vcombine.high %v64_v14, %v64_v14  ;;  %v120_v27 = vcombine.high %v112_v18, %v112_v18  ;;  %v121_v30 = vcombine.high %v119_v24, %v119_v24  ;;  %v147_v32 = vsel %vm82_vm0, %v112_v18, 0.0 }
  0x24   :  { %v84_v20 = vsel %vm82_vm0, %v55_v13, 0.0  ;;  %v88_v26 = vsel %vm82_vm0, %v56_v19, 0.0  ;;  %v90_v33 = vsel %vm82_vm0, %v64_v14, 0.0  ;;  %v150_v35 = vsel %vm82_vm0, %v119_v24, 0.0 }
  0x25   :  { %v85_v23 = vadd.f32 %v84_v20, %v83_v15  ;;  %v148_v34 = vsel %vm82_vm0, %v120_v27, 0.0  ;;  %v73_v36 = vcombine.high %v71_v22, %v71_v22  ;;  %v92_v39 = vsel %vm82_vm0, %v72_v25, 0.0 }
  0x26   :  { %v149_v38 = vadd.f32 %v148_v34, %v147_v32  ;;  %v137_v41 = vcombine.high %v129_v31, %v129_v31  ;;  %v152_v42 = vsel %vm82_vm0, %v121_v30, 0.0  ;;  %v94_v45 = vsel %vm82_vm0, %v71_v22, 0.0 }
  0x27   :  { %v87_v29 = vadd.f32 %v86_v21, %v85_v23  ;;  %v154_v46 = vsel %vm82_vm0, %v129_v31, 0.0  ;;  %v96_v49 = vsel %vm82_vm0, %v73_v36, 0.0  ;;  %v138_v50 = vcombine.high %v136_v40, %v136_v40 }
  0x28   :  { %v151_v44 = vadd.f32 %v150_v35, %v149_v38  ;;  %v156_v51 = vsel %vm82_vm0, %v137_v41, 0.0  ;;  %v158_v54 = vsel %vm82_vm0, %v136_v40, 0.0  ;;  %v309_v8 = vmov 1  }
  0x29   :  { %v89_v37 = vadd.f32 %v88_v26, %v87_v29  ;;  %v160_v57 = vsel %vm82_vm0, %v138_v50, 0.0  ;;  %234 = vset.pattern.permute.xlu0 %v309_v8  ;;  %v171_v10 = vadd.f32 1.0, %v170_v9  ;;  %v311_v16 = vmov 269488144  }
  0x2a   :  { %v153_v48 = vadd.f32 %v152_v42, %v151_v44  ;;  %v184_v17 = vunpack.c.l.s4 %v311_v16 }
  0x2b   :  { %v91_v43 = vadd.f32 %v90_v33, %v89_v37 }
  0x2c   :  { %v155_v53 = vadd.f32 %v154_v46, %v153_v48  ;;  %v185_v18 = vunpack.c.0.s8 %v184_v17 }
  0x2d   :  { %v93_v47 = vadd.f32 %v92_v39, %v91_v43 }
  0x2e   :  { %v157_v56 = vadd.f32 %v156_v51, %v155_v53  ;;  %v188_v19 = vsub.s32 %v185_v18, %v334_v3 }
  0x2f   :  { %v95_v52 = vadd.f32 %v94_v45, %v93_v47 }
  0x30   :  { %v159_v58 = vadd.f32 %v158_v54, %v157_v56 }
  0x31   :  { %v97_v55 = vadd.f32 %v96_v49, %v95_v52 }
  0x32   :  { %v161_v59 = vadd.f32 %v160_v57, %v159_v58 }
  0x33   :  { %98 = vadd.xlane.f32.xlu0 %v97_v55 }
  0x37   :  { %162 = vadd.xlane.f32.xlu0 %v161_v59 }
  0xbc   :  { %v99_v61 = vpop.xlane.xlu0 %98 }
  0xbd   :  { %v100_v62 = vmul.f32 0.0009765625, %v99_v61 }
  0xbf   :  { %v165_v0 = vmul.f32 %v100_v62, %v100_v62 }
  0xc0   :  { %v163_v63 = vpop.xlane.xlu0 %162 }
  0xc1   :  { %v164_v1 = vmul.f32 0.0009765625, %v163_v63 }
  0xc3   :  { %v166_v2 = vsub.f32 %v164_v1, %v165_v0 }
  0xc5   :  { %v167_v4 = vmax.f32 %v166_v2, 0.0 }
  0xc7   :  { %v168_v5 = vadd.f32 1e-05, %v167_v4 }
  0xc9   :  { %237 = vrsqrt.f32 %v168_v5 }
  0xd6   :  { %v238_v11 = vpop.eup %237 }
  0xd7   :  { %v172_v12 = vmul.f32 %v238_v11, %v171_v10 }
  0xd9   :  { %v173_v13 = vmul.f32 %v172_v12, %v100_v62 }
  0xdb   :  { %175 = vrot.lane.b32.xlu1 %v173_v13, %s310_s0 }
  0xdf   :  { %181 = vperm.xlu1 %233, %v172_v12  }
 0x14d   :  { %v176_v14 = vpop.permute.xlu1 %175 }
 0x14e   :  { %v178_v15 = vsub.f32 %v170_v9, %v176_v14 }
 0x150   :  { %195 = vperm.xlu0 %234, %v178_v15  }
 0x15a   :  { %v182_v20 = vpop.permute.xlu1 %181 }
 0x15b   :  { %v189_v21 = vrot.slane %v182_v20, %v188_v19 }
 0x15d   :  { %v191_v23 = vmul.f32 %v189_v21, %v337_v6  ;;  %v192_v24 = vmul.f32 %v189_v21, %v339_v7 }
 0x1cb   :  { %v196_v22 = vpop.permute.xlu0 %195 }
 0x1cc   :  { %v203_v25 = vrot.slane %v196_v22, %v188_v19 }
 0x1ce   :  { %v205_v26 = vadd.f32 %v203_v25, %v191_v23  ;;  %v206_v27 = vadd.f32 %v203_v25, %v192_v24 }
 0x1d0   :  { %207 = vst [vmem:[#allocation7] sm:$0xff] %v205_v26  ;;  %208 = vst [vmem:[#allocation7 + $0x8] sm:$0xff] %v206_v27 }
 0x1d1   :  { %290 = shalt.err (!%p287_p0)
}
 0x1d2   :  { %218 = dma.vmem_to_hbm [thread:$0]  %s216_s19, 256, %s375_s2, [#allocation4]  }
 0x1d3   :  { %303 = dma.done.wait [#allocation4], 256  }
 0x1d4   :  { %304 = vsyncadd [#allocation4], 4294967040 }
 0x1d5   :  { %222 = vsyncpa [#allocation3], 1 }
 0x1d6   :  { %223 = vsyncpa [#allocation6], 1 }
 0x1d7   :  { %224 = vsyncpa [#allocation4], 1 }

</bundles_post_ra>
